<compile_context>
chip_gen: v5e
topology: v5e:2x2
jax: 0.10.0
libtpu: 0.0.40
codegen_flags: <defaults>
</compile_context>

<pallas_src>
import jax
import jax.numpy as jnp
from jax import lax
from jax.experimental import pallas as pl
from jax.experimental.pallas import tpu as pltpu

LN_EPS = 1e-5  # nn.LayerNorm default eps
_HIGHEST = jax.lax.Precision.HIGHEST


def seminorm_kernel(x_ref, gamma_ref, beta_ref, aseg_ref, bcast_ref,
                    wm_ref, ws_ref, b_ref, o_ref):
    # x_ref block: (Bt, C, L) -- Bt batch elements, spatial dims flattened.
    x3 = x_ref[...].astype(jnp.float32)
    bt, c, l = x3.shape
    xx3 = x3 * x3                                  # reused for both variances
    n = jnp.float32(l)

    # ---- per-(b, c) mean / unbiased std over all L spatial positions -------
    s1 = jnp.sum(x3, axis=-1)                       # (Bt, C)
    s2 = jnp.sum(xx3, axis=-1)                      # (Bt, C)
    mean_c = s1 / n
    var_u = (s2 - n * mean_c * mean_c) / jnp.float32(max(l - 1, 1))
    std_c = jnp.sqrt(jnp.maximum(var_u, 0.0))       # torch.std: ddof=1

    # ---- tiny Linear on cat(mean, std), row layout: (Bt, C) @ (C, C) -------
    lin = (jnp.dot(mean_c, wm_ref[...], precision=_HIGHEST,
                   preferred_element_type=jnp.float32)
           + jnp.dot(std_c, ws_ref[...], precision=_HIGHEST,
                     preferred_element_type=jnp.float32)
           + b_ref[...])                            # (Bt, C)

    # ---- LayerNorm over each length-W segment, kept lane-dense -------------
    x2 = x3.reshape(bt * c, l)
    xx2 = xx3.reshape(bt * c, l)
    aseg = aseg_ref[...]                            # (L, H) averaging (1/W)
    bcast = bcast_ref[...]                          # (H, L) 0/1 broadcast-back
    mw = jnp.dot(x2, aseg, precision=_HIGHEST,
                 preferred_element_type=jnp.float32)      # (R, H) segment means
    ms2 = jnp.dot(xx2, aseg, precision=_HIGHEST,
                  preferred_element_type=jnp.float32)     # (R, H) segment E[x^2]
    inv = lax.rsqrt(jnp.maximum(ms2 - mw * mw, 0.0) + LN_EPS)
    mw_full = jnp.dot(mw, bcast, precision=_HIGHEST,
                      preferred_element_type=jnp.float32)   # (R, L)
    inv_full = jnp.dot(inv, bcast, precision=_HIGHEST,
                       preferred_element_type=jnp.float32)  # (R, L)
    y2 = (x2 - mw_full) * inv_full * gamma_ref[...] + beta_ref[...]

    # ---- broadcast add of the linear features over spatial positions -------
    out = y2.reshape(bt, c, l) + lin[:, :, None]
    o_ref[...] = out.astype(o_ref.dtype)


def _vmem_limit_bytes():
    """Scoped VMEM limit sized per generation (v5e/v6e: 128 MiB, v7x: 64 MiB)."""
    try:
        phys = int(pltpu.get_tpu_info().vmem_capacity_bytes)
    except Exception:
        phys = 64 * 1024 * 1024  # conservative (v7x-sized) fallback
    return min(phys // 2, 64 * 1024 * 1024)


def seminorm(x, gamma, beta, w, b):
    """x: (B, C, H, W) with C == in_size, W == in_size.
    gamma, beta: (in_size,) LayerNorm affine params.
    w: (in_size, 2*in_size), b: (in_size,) Linear params."""
    B, C, H, W = x.shape
    L = H * W
    in_size = gamma.shape[0]
    # The PyTorch module implicitly requires these; fail loudly instead of
    # producing silently-wrong Linear/LayerNorm behavior.
    assert C == in_size and W == in_size, (x.shape, in_size)
    assert w.shape == (in_size, 2 * in_size), w.shape
    assert b.shape == (in_size,) and beta.shape == (in_size,)

    x_flat = x.reshape(B, C, L)

    # Lane-dense parameter layouts.
    gamma_t = jnp.tile(gamma.astype(jnp.float32), H).reshape(1, L)   # gamma[l % W]
    beta_t = jnp.tile(beta.astype(jnp.float32), H).reshape(1, L)
    wm_t = w[:, :C].T.astype(jnp.float32)            # (C, C): mean -> lin
    ws_t = w[:, C:].T.astype(jnp.float32)            # (C, C): std  -> lin
    b_row = b.reshape(1, C).astype(jnp.float32)

    # Segment-reduce / broadcast-back matrices for LayerNorm over each W chunk.
    seg = jnp.arange(L, dtype=jnp.int32) // W        # segment id per position
    hid = jnp.arange(H, dtype=jnp.int32)
    aseg = (seg[:, None] == hid[None, :]).astype(jnp.float32) / W    # (L, H)
    bcast = (hid[:, None] == seg[None, :]).astype(jnp.float32)       # (H, L)

    # --- batch-block size from the per-generation VMEM budget ---------------
    vmem_limit = _vmem_limit_bytes()
    # Leave headroom for double-buffered in/out DMA tiles plus f32 temporaries.
    tile_budget = max(vmem_limit // 16, 1 << 20)
    bytes_per_batch = C * L * 4                      # budgeted at f32
    bt = max(1, min(B, tile_budget // max(bytes_per_batch, 1)))
    if bt >= B and B > 1:
        bt = (B + 1) // 2        # keep >= 2 grid steps so both v7x TCs get work
    grid = (pl.cdiv(B, bt),)

    out_flat = pl.pallas_call(
        seminorm_kernel,
        out_shape=jax.ShapeDtypeStruct((B, C, L), x.dtype),
        grid_spec=pltpu.PrefetchScalarGridSpec(
            num_scalar_prefetch=0,
            grid=grid,
            in_specs=[
                pl.BlockSpec((bt, C, L), lambda i: (i, 0, 0)),
                pl.BlockSpec((1, L), lambda i: (0, 0)),
                pl.BlockSpec((1, L), lambda i: (0, 0)),
                pl.BlockSpec((L, H), lambda i: (0, 0)),
                pl.BlockSpec((H, L), lambda i: (0, 0)),
                pl.BlockSpec((C, C), lambda i: (0, 0)),
                pl.BlockSpec((C, C), lambda i: (0, 0)),
                pl.BlockSpec((1, C), lambda i: (0, 0)),
            ],
            out_specs=pl.BlockSpec((bt, C, L), lambda i: (i, 0, 0)),
        ),
        compiler_params=pltpu.CompilerParams(
            dimension_semantics=("parallel",),
            vmem_limit_bytes=vmem_limit),
    )(x_flat, gamma_t, beta_t, aseg, bcast, wm_t, ws_t, b_row)

    return out_flat.reshape(B, C, H, W)


def seminorm_ref(x, gamma, beta, w, b):
    """Pure-JAX reference mirroring the PyTorch forward."""
    B, C, H, W = x.shape
    flat = x.reshape(B, C, -1)
    mean = flat.mean(axis=-1)                        # (B, C)
    std = flat.std(axis=-1, ddof=1)                  # (B, C), unbiased like torch.std
    mu = x.mean(axis=-1, keepdims=True)
    var = x.var(axis=-1, keepdims=True)              # biased, like LayerNorm
    y = (x - mu) / jnp.sqrt(var + LN_EPS) * gamma + beta
    feat = jnp.concatenate([mean, std], axis=1)
    lin = jnp.dot(feat, w.T, precision=_HIGHEST) + b  # (B, C)
    out = y.reshape(B, C, -1) + lin[:, :, None]
    return out.reshape(x.shape)


if __name__ == "__main__":
    key = jax.random.PRNGKey(0)
    in_size = 16
    B, C, H, W = 2, in_size, 8, in_size              # C == W == in_size; H*W = 128

    kx, kw, kb, kg, kbe = jax.random.split(key, 5)
    x = jax.random.normal(kx, (B, C, H, W), jnp.float32)
    # deterministic synthetic params (Linear(2*in_size, in_size) + LayerNorm(in_size))
    w = jax.random.normal(kw, (in_size, 2 * in_size), jnp.float32) / jnp.sqrt(2.0 * in_size)
    b = 0.1 * jax.random.normal(kb, (in_size,), jnp.float32)
    gamma = 1.0 + 0.1 * jax.random.normal(kg, (in_size,), jnp.float32)
    beta = 0.1 * jax.random.normal(kbe, (in_size,), jnp.float32)

    out = jax.block_until_ready(seminorm(x, gamma, beta, w, b))
    ref = seminorm_ref(x, gamma, beta, w, b)
    assert out.shape == x.shape and out.dtype == x.dtype
    err = float(jnp.max(jnp.abs(out - ref)))
    assert jnp.allclose(out, ref, rtol=1e-4, atol=1e-4), err
    print("KERNEL_OK")
</pallas_src>

<mosaic_0001>
module attributes {stable_mosaic.version = 11 : i64} {
  func.func @seminorm_kernel(%arg0: i32, %arg1: memref<1x16x128xf32, #tpu.memory_space<vmem>>, %arg2: memref<1x128xf32, #tpu.memory_space<vmem>>, %arg3: memref<1x128xf32, #tpu.memory_space<vmem>>, %arg4: memref<128x8xf32, #tpu.memory_space<vmem>>, %arg5: memref<8x128xf32, #tpu.memory_space<vmem>>, %arg6: memref<16x16xf32, #tpu.memory_space<vmem>>, %arg7: memref<16x16xf32, #tpu.memory_space<vmem>>, %arg8: memref<1x16xf32, #tpu.memory_space<vmem>>, %arg9: memref<1x16x128xf32, #tpu.memory_space<vmem>>) attributes {dimension_semantics = [#tpu.dimension_semantics<parallel>], iteration_bounds = array<i64: 2>, scalar_prefetch = 0 : i64, scratch_operands = 0 : i64, tpu.core_type = #tpu.core_type<tc>, window_params = [{transform_indices = @transform_0, window_bounds = array<i64: 1, 16, 128>}, {pipeline_mode = #tpu.pipeline_mode<synchronous>, transform_indices = @transform_1, window_bounds = array<i64: 1, 128>}, {pipeline_mode = #tpu.pipeline_mode<synchronous>, transform_indices = @transform_2, window_bounds = array<i64: 1, 128>}, {pipeline_mode = #tpu.pipeline_mode<synchronous>, transform_indices = @transform_3, window_bounds = array<i64: 128, 8>}, {pipeline_mode = #tpu.pipeline_mode<synchronous>, transform_indices = @transform_4, window_bounds = array<i64: 8, 128>}, {pipeline_mode = #tpu.pipeline_mode<synchronous>, transform_indices = @transform_5, window_bounds = array<i64: 16, 16>}, {pipeline_mode = #tpu.pipeline_mode<synchronous>, transform_indices = @transform_6, window_bounds = array<i64: 16, 16>}, {pipeline_mode = #tpu.pipeline_mode<synchronous>, transform_indices = @transform_7, window_bounds = array<i64: 1, 16>}, {transform_indices = @transform_8, window_bounds = array<i64: 1, 16, 128>}]} {
    %c0 = arith.constant 0 : index
    %c0_0 = arith.constant 0 : index
    %c0_1 = arith.constant 0 : index
    %0 = vector.load %arg1[%c0, %c0_0, %c0_1] : memref<1x16x128xf32, #tpu.memory_space<vmem>>, vector<1x16x128xf32>
    %1 = arith.mulf %0, %0 : vector<1x16x128xf32>
    %cst = arith.constant dense<0.000000e+00> : vector<1x16xf32>
    %2 = vector.multi_reduction <add>, %0, %cst [2] : vector<1x16x128xf32> to vector<1x16xf32>
    %cst_2 = arith.constant dense<0.000000e+00> : vector<1x16xf32>
    %3 = vector.multi_reduction <add>, %1, %cst_2 [2] : vector<1x16x128xf32> to vector<1x16xf32>
    %cst_3 = arith.constant 1.280000e+02 : f32
    %4 = vector.broadcast %cst_3 : f32 to vector<1x16xf32>
    %5 = arith.divf %2, %4 : vector<1x16xf32>
    %cst_4 = arith.constant 1.280000e+02 : f32
    %6 = vector.broadcast %cst_4 : f32 to vector<1x16xf32>
    %7 = arith.mulf %6, %5 : vector<1x16xf32>
    %8 = arith.mulf %7, %5 : vector<1x16xf32>
    %9 = arith.subf %3, %8 : vector<1x16xf32>
    %cst_5 = arith.constant 1.270000e+02 : f32
    %10 = vector.broadcast %cst_5 : f32 to vector<1x16xf32>
    %11 = arith.divf %9, %10 : vector<1x16xf32>
    %cst_6 = arith.constant 0.000000e+00 : f32
    %12 = vector.broadcast %cst_6 : f32 to vector<1x16xf32>
    %13 = arith.maximumf %11, %12 : vector<1x16xf32>
    %14 = math.sqrt %13 : vector<1x16xf32>
    %c0_7 = arith.constant 0 : index
    %c0_8 = arith.constant 0 : index
    %15 = vector.load %arg6[%c0_7, %c0_8] : memref<16x16xf32, #tpu.memory_space<vmem>>, vector<16x16xf32>
    %cst_9 = arith.constant dense<0.000000e+00> : vector<1x16xf32>
    %16 = tpu.matmul %5, %15, %cst_9 {dimension_numbers = #tpu.dot_dimension_numbers<[1], [0], [0], [1], [0, 0, 1, 1], [], []>, precision = #tpu.contract_precision<fp32>} : vector<1x16xf32>, vector<16x16xf32>, vector<1x16xf32> -> vector<1x16xf32>
    %c0_10 = arith.constant 0 : index
    %c0_11 = arith.constant 0 : index
    %17 = vector.load %arg7[%c0_10, %c0_11] : memref<16x16xf32, #tpu.memory_space<vmem>>, vector<16x16xf32>
    %cst_12 = arith.constant dense<0.000000e+00> : vector<1x16xf32>
    %18 = tpu.matmul %14, %17, %cst_12 {dimension_numbers = #tpu.dot_dimension_numbers<[1], [0], [0], [1], [0, 0, 1, 1], [], []>, precision = #tpu.contract_precision<fp32>} : vector<1x16xf32>, vector<16x16xf32>, vector<1x16xf32> -> vector<1x16xf32>
    %19 = arith.addf %16, %18 : vector<1x16xf32>
    %c0_13 = arith.constant 0 : index
    %c0_14 = arith.constant 0 : index
    %20 = vector.load %arg8[%c0_13, %c0_14] : memref<1x16xf32, #tpu.memory_space<vmem>>, vector<1x16xf32>
    %21 = arith.addf %19, %20 : vector<1x16xf32>
    %22 = vector.shape_cast %0 : vector<1x16x128xf32> to vector<16x128xf32>
    %23 = vector.shape_cast %1 : vector<1x16x128xf32> to vector<16x128xf32>
    %c0_15 = arith.constant 0 : index
    %c0_16 = arith.constant 0 : index
    %24 = vector.load %arg4[%c0_15, %c0_16] : memref<128x8xf32, #tpu.memory_space<vmem>>, vector<128x8xf32>
    %c0_17 = arith.constant 0 : index
    %c0_18 = arith.constant 0 : index
    %25 = vector.load %arg5[%c0_17, %c0_18] : memref<8x128xf32, #tpu.memory_space<vmem>>, vector<8x128xf32>
    %cst_19 = arith.constant dense<0.000000e+00> : vector<16x8xf32>
    %26 = tpu.matmul %22, %24, %cst_19 {dimension_numbers = #tpu.dot_dimension_numbers<[1], [0], [0], [1], [0, 0, 1, 1], [], []>, precision = #tpu.contract_precision<fp32>} : vector<16x128xf32>, vector<128x8xf32>, vector<16x8xf32> -> vector<16x8xf32>
    %cst_20 = arith.constant dense<0.000000e+00> : vector<16x8xf32>
    %27 = tpu.matmul %23, %24, %cst_20 {dimension_numbers = #tpu.dot_dimension_numbers<[1], [0], [0], [1], [0, 0, 1, 1], [], []>, precision = #tpu.contract_precision<fp32>} : vector<16x128xf32>, vector<128x8xf32>, vector<16x8xf32> -> vector<16x8xf32>
    %28 = arith.mulf %26, %26 : vector<16x8xf32>
    %29 = arith.subf %27, %28 : vector<16x8xf32>
    %cst_21 = arith.constant 0.000000e+00 : f32
    %30 = vector.broadcast %cst_21 : f32 to vector<16x8xf32>
    %31 = arith.maximumf %29, %30 : vector<16x8xf32>
    %cst_22 = arith.constant 9.99999974E-6 : f32
    %32 = vector.broadcast %cst_22 : f32 to vector<16x8xf32>
    %33 = arith.addf %31, %32 : vector<16x8xf32>
    %34 = math.rsqrt %33 : vector<16x8xf32>
    %cst_23 = arith.constant dense<0.000000e+00> : vector<16x128xf32>
    %35 = tpu.matmul %26, %25, %cst_23 {dimension_numbers = #tpu.dot_dimension_numbers<[1], [0], [0], [1], [0, 0, 1, 1], [], []>, precision = #tpu.contract_precision<fp32>} : vector<16x8xf32>, vector<8x128xf32>, vector<16x128xf32> -> vector<16x128xf32>
    %cst_24 = arith.constant dense<0.000000e+00> : vector<16x128xf32>
    %36 = tpu.matmul %34, %25, %cst_24 {dimension_numbers = #tpu.dot_dimension_numbers<[1], [0], [0], [1], [0, 0, 1, 1], [], []>, precision = #tpu.contract_precision<fp32>} : vector<16x8xf32>, vector<8x128xf32>, vector<16x128xf32> -> vector<16x128xf32>
    %37 = arith.subf %22, %35 : vector<16x128xf32>
    %38 = arith.mulf %37, %36 : vector<16x128xf32>
    %c0_25 = arith.constant 0 : index
    %c0_26 = arith.constant 0 : index
    %39 = vector.load %arg2[%c0_25, %c0_26] : memref<1x128xf32, #tpu.memory_space<vmem>>, vector<1x128xf32>
    %40 = vector.broadcast %39 : vector<1x128xf32> to vector<16x128xf32>
    %41 = arith.mulf %38, %40 : vector<16x128xf32>
    %c0_27 = arith.constant 0 : index
    %c0_28 = arith.constant 0 : index
    %42 = vector.load %arg3[%c0_27, %c0_28] : memref<1x128xf32, #tpu.memory_space<vmem>>, vector<1x128xf32>
    %43 = vector.broadcast %42 : vector<1x128xf32> to vector<16x128xf32>
    %44 = arith.addf %41, %43 : vector<16x128xf32>
    %45 = vector.shape_cast %44 : vector<16x128xf32> to vector<1x16x128xf32>
    %46 = vector.shape_cast %21 : vector<1x16xf32> to vector<1x16x1xf32>
    %47 = vector.broadcast %46 : vector<1x16x1xf32> to vector<1x16x128xf32>
    %48 = arith.addf %45, %47 : vector<1x16x128xf32>
    %c0_29 = arith.constant 0 : index
    %c0_30 = arith.constant 0 : index
    %c0_31 = arith.constant 0 : index
    %49 = vector.load %arg9[%c0_29, %c0_30, %c0_31] : memref<1x16x128xf32, #tpu.memory_space<vmem>>, vector<1x16x128xf32>
    tpu.vector_store %arg9[%c0_29, %c0_30, %c0_31], %48 {strides = array<i32>} : memref<1x16x128xf32, #tpu.memory_space<vmem>>, vector<1x16x128xf32>,
    return
  }
  func.func @transform_0(%arg0: i32) -> (i32, i32, i32) {
    %c0_i32 = arith.constant 0 : i32
    %c0_i32_0 = arith.constant 0 : i32
    %c0_i32_1 = arith.constant 0 : i32
    return %arg0, %c0_i32, %c0_i32_0 : i32, i32, i32
  }
  func.func @transform_1(%arg0: i32) -> (i32, i32) {
    %c0_i32 = arith.constant 0 : i32
    %c0_i32_0 = arith.constant 0 : i32
    %c0_i32_1 = arith.constant 0 : i32
    return %c0_i32, %c0_i32_0 : i32, i32
  }
  func.func @transform_2(%arg0: i32) -> (i32, i32) {
    %c0_i32 = arith.constant 0 : i32
    %c0_i32_0 = arith.constant 0 : i32
    %c0_i32_1 = arith.constant 0 : i32
    return %c0_i32, %c0_i32_0 : i32, i32
  }
  func.func @transform_3(%arg0: i32) -> (i32, i32) {
    %c0_i32 = arith.constant 0 : i32
    %c0_i32_0 = arith.constant 0 : i32
    %c0_i32_1 = arith.constant 0 : i32
    return %c0_i32, %c0_i32_0 : i32, i32
  }
  func.func @transform_4(%arg0: i32) -> (i32, i32) {
    %c0_i32 = arith.constant 0 : i32
    %c0_i32_0 = arith.constant 0 : i32
    %c0_i32_1 = arith.constant 0 : i32
    return %c0_i32, %c0_i32_0 : i32, i32
  }
  func.func @transform_5(%arg0: i32) -> (i32, i32) {
    %c0_i32 = arith.constant 0 : i32
    %c0_i32_0 = arith.constant 0 : i32
    %c0_i32_1 = arith.constant 0 : i32
    return %c0_i32, %c0_i32_0 : i32, i32
  }
  func.func @transform_6(%arg0: i32) -> (i32, i32) {
    %c0_i32 = arith.constant 0 : i32
    %c0_i32_0 = arith.constant 0 : i32
    %c0_i32_1 = arith.constant 0 : i32
    return %c0_i32, %c0_i32_0 : i32, i32
  }
  func.func @transform_7(%arg0: i32) -> (i32, i32) {
    %c0_i32 = arith.constant 0 : i32
    %c0_i32_0 = arith.constant 0 : i32
    %c0_i32_1 = arith.constant 0 : i32
    return %c0_i32, %c0_i32_0 : i32, i32
  }
  func.func @transform_8(%arg0: i32) -> (i32, i32, i32) {
    %c0_i32 = arith.constant 0 : i32
    %c0_i32_0 = arith.constant 0 : i32
    %c0_i32_1 = arith.constant 0 : i32
    return %arg0, %c0_i32, %c0_i32_0 : i32, i32, i32
  }
}

</mosaic_0001>

<bundles_post_ra>
// kernel: tpu_custom_call.1
= control target key start
LH: loop header
LB: loop body
LE: loop exit
PB: predicated region body
PF: predicated region fallthrough
CT: control target
= control target key end

     0   :  { %13 = vsyncpa [#allocation3], 0  ;;  %s2840_s0 = inlined_call_operand.vmem [shape: f32[2,16,128], index: 0, kind: input, shape index: {}]   ;;  %s2841_s1 = inlined_call_operand.vmem [shape: f32[1,128], index: 1, kind: input, shape index: {}]   ;;  %s2842_s2 = inlined_call_operand.vmem [shape: f32[1,128], index: 2, kind: input, shape index: {}]   ;;  %s2843_s3 = inlined_call_operand.vmem [shape: f32[128,8], index: 3, kind: input, shape index: {}]   ;;  %s2844_s4 = inlined_call_operand.vmem [shape: f32[8,128], index: 4, kind: input, shape index: {}]   ;;  %s2845_s5 = inlined_call_operand.vmem [shape: f32[16,16], index: 5, kind: input, shape index: {}]   ;;  %s2846_s6 = inlined_call_operand.vmem [shape: f32[16,16], index: 6, kind: input, shape index: {}]   ;;  %s2847_s7 = inlined_call_operand.vmem [shape: f32[1,16], index: 7, kind: input, shape index: {}]   ;;  %s2848_s8 = inlined_call_operand.hbm [shape: f32[2,16,128], index: 8, kind: output, shape index: {}]  }
   0x1   :  { %15 = vsyncpa [#allocation3 + $0x1], 0  ;;  %s2165_s27 = smov 0   ;;  %s2167_s28 = smov 0  }
   0x2   :  { %s2169_s29 = smov 0   ;;  %s2171_s30 = smov 0  }
   0x3 LB: > { %s2186_s9 = sadd.s32 4294967295, %s2114_s30   ;;  %s1976_s10 = sadd.s32 4294967294, %s2114_s30   ;;  %s2114_s30 = sphi %s2171_s30, %s2877_s30   ;;  %s2110_s29 = sphi %s2169_s29, %s2876_s29   ;;  %s2106_s28 = sphi %s2167_s28, %s2875_s28   ;;  %s2102_s27 = sphi %s2165_s27, %s2874_s27  }
   0x4   : > { %s2190_s11 = sadd.s32 1, %s2114_s30   ;;  %s201_s12 = sadd.s32 1, %s2110_s29 }
   0x5   : > { %s198_s13 = ssub.s32 %s2114_s30, %s2190_s11  ;;  %p211_p0 = scmp.ne.s32.totalorder %s2110_s29, %s2106_s28 }
   0x6   : > { %p199_p1 = scmp.eq.s32.totalorder %s198_s13, 0  ;;  %p212_p2 = scmp.eq.s32.totalorder %s2186_s9, 1 }
   0x7   : > { %p217_p3 = scmp.ne.s32.totalorder %s2106_s28, %s2102_s27  ;;  %p218_p4 = scmp.eq.s32.totalorder %s1976_s10, 1 }
   0x8   : > { %s2201_s14 = scalar_select %p199_p1, %s2110_s29, %s201_s12  }
   0x9   : > { %p2203_p5 = por %p212_p2, %p211_p0  ;;  %p2207_p6 = por %p218_p4, %p217_p3 }
   0xa   : > { %p1979_p7 = scmp.ge.s32.totalorder %s2114_s30, 1  ;;  %p265_p8 = scmp.lt.s32.totalorder %s2114_s30, 3 }
   0xc   : > { %p266_p9 = pnand %p1979_p7, %p265_p8 }
   0xe   : > { %269 = sbr.rel (%p266_p9) target bundleno = 649 (0x289), region = 52 }
  0x13   : > { %p299_p10 = scmp.lt.s32.totalorder %s2186_s9, 1  ;;  %v2116_v4 = vmov 128.0   ;;  %v2117_v6 = vmov 127.0   ;;  %v369_v14 = vld [vmem:[%s2846_s6 + $0x8] sm:$0xff]  ;;  %v368_v15 = vld [vmem:[%s2846_s6] sm:$0xff]  ;;  %v2849_v52 = vlaneseq  ;;  %vm377_vm2 = vcmask 130112  }
  0x14   : > { %2038 = vrcp.f32 %v2116_v4  ;;  %v396_v16 = vand.u32 4294901760, %v369_v14  ;;  %v398_v17 = vand.u32 4294901760, %v368_v15  ;;  %v367_v44 = vld [vmem:[%s2845_s5 + $0x8] sm:$0xff]  ;;  %v366_v47 = vld [vmem:[%s2845_s5] sm:$0xff]  ;;  %vm379_vm3 = vcmask 130048   ;;  %s296_s19 = sand.u32 1, %s2106_s28  }
  0x15   : > { %s300_s17 = scalar_select %p299_p10, %s2186_s9, 1  ;;  %2040 = vrcp.f32 %v2117_v6  ;;  %v2251_v45 = vand.u32 4294901760, %v367_v44  ;;  %v2257_v48 = vand.u32 4294901760, %v366_v47  ;;  %v373_v59 = vand.u32 127, %v2849_v52 }
  0x16   : > { %v424_v20 = vsub.f32 %v369_v14, %v396_v16  ;;  %v430_v21 = vsub.f32 %v368_v15, %v398_v17  ;;  %481 = vmatpush.msra.mxu3 %v396_v16  ;;  %397 = vmatpush.msra.mxu0 %v396_v16  ;;  %vm1498_vm8 = vcmask 64512   ;;  %s1980_s23 = sshll.u32 %s296_s19, 4  ;;  %s1989_s24 = sshll.u32 %s2186_s9, 4 }
  0x17   : > { %s1988_s18 = sshll.u32 %s300_s17, 4  ;;  %v2260_v49 = vsub.f32 %v367_v44, %v2251_v45  ;;  %v2265_v55 = vsub.f32 %v366_v47, %v2257_v48  ;;  %v375_v63 = vadd.s32 4294967288, %v373_v59  ;;  %s1910_s10 = scalar_lea.hbm %s2848_s8, %s1989_s24 }
  0x18   : > { %s2218_s21 = scalar_lea.vmem %s2840_s0, %s1988_s18  ;;  %v425_v24 = vand.u32 4294901760, %v424_v20  ;;  %v431_v25 = vand.u32 4294901760, %v430_v21  ;;  %456 = vmatpush.msra.mxu2 %v424_v20  ;;  %483 = vmatpush.msra.mxu3 %v398_v17  ;;  %s298_s12 = scalar_lea.vmem [#allocation2], %s1980_s23 }
  0x19   : > { %v2221_v0 = vld [vmem:[%s2218_s21] sm:$0xff]  ;;  %v2230_v2 = vld [vmem:[%s2218_s21 + $0x8] sm:$0xff]  ;;  %399 = vmatpush.msra.mxu0 %v398_v17  ;;  %v591_v54 = vand.u32 4294901760, %v2260_v49  ;;  %v597_v58 = vand.u32 4294901760, %v2265_v55  ;;  %s1911_s13 = sshll.u32 %s298_s12, 4  ;;  %s1913_s17 = sshll.u32 %s1910_s10, 4  ;;  %s1912_s13 = int_to_ptr.vmem [resolvable:$true] %s1911_s13  ;;  %s1914_s17 = int_to_ptr.hbm [resolvable:$true] %s1913_s17 }
  0x1a   : > { %308 = vadd.xlane.f32.xlu0 %v2221_v0  ;;  %v2226_v1 = vmul.f32 %v2221_v0, %v2221_v0  ;;  %v2234_v3 = vmul.f32 %v2230_v2, %v2230_v2  ;;  %v2039_v5 = vpop.eup %2038  ;;  %v426_v29 = vsub.f32 %v424_v20, %v425_v24  ;;  %v432_v30 = vsub.f32 %v430_v21, %v431_v25  ;;  %s1899_s9 = scalar_lea.sflag [#allocation3], %s296_s19  ;;  %s2072_s23 = scalar_lea.hbm %s2848_s8, 32 }
  0x1b   : > { %v317_v7 = vmul.f32 128.0, %v2039_v5  ;;  %v2041_v9 = vpop.eup %2040  ;;  %vm321_vm0 = vweird.f32 %v2039_v5  ;;  %459 = vmatpush.msra.mxu2 %v430_v21  ;;  %508 = vmatpush.msrb.mxu0 %v425_v24  ;;  %v592_v57 = vsub.f32 %v2260_v49, %v591_v54  ;;  %v598_v62 = vsub.f32 %v2265_v55, %v597_v58 }
  0x1c   : > { %312 = vadd.xlane.f32.xlu1 %v2226_v1  ;;  %v332_v11 = vmul.f32 127.0, %v2041_v9  ;;  %vm336_vm1 = vweird.f32 %v2041_v9  ;;  %v427_v32 = vand.u32 4294901760, %v426_v29  ;;  %v433_v33 = vand.u32 4294901760, %v432_v30 }
  0x1d   : > { %v318_v8 = vsub.f32 1.0, %v317_v7  ;;  %512 = vmatpush.msrb.mxu0 %v431_v25  ;;  %563 = vmatpush.msrb.mxu2 %v2251_v45  ;;  %v593_v61 = vand.u32 4294901760, %v592_v57 }
  0x1e   : > { %v333_v13 = vsub.f32 1.0, %v332_v11  ;;  %428 = vmatpush.msra.mxu1 %v427_v32 }
  0x1f   : > { %v319_v10 = vmul.f32 %v2039_v5, %v318_v8  ;;  %565 = vmatpush.msrb.mxu2 %v2257_v48  ;;  %594 = vmatpush.msrb.mxu3 %v593_v61 }
  0x20   : > { %v334_v19 = vmul.f32 %v2041_v9, %v333_v13  ;;  %434 = vmatpush.msra.mxu1 %v433_v33 }
  0x21   : > { %v320_v12 = vadd.f32 %v2039_v5, %v319_v10 }
  0x22   : > { %310 = vadd.xlane.f32.xlu0 %v2230_v2  ;;  %v335_v26 = vadd.f32 %v2041_v9, %v334_v19  ;;  %533 = vmatpush.msrb.mxu1 %v396_v16  ;;  %v724_v16 = vld [vmem:[%s2843_s3 + $0x78] sm:$0xff] }
  0x23   : > { %v322_v18 = vsel %vm321_vm0, %v2039_v5, %v320_v12  ;;  %v599_v5 = vand.u32 4294901760, %v598_v62  ;;  %v2281_v21 = vand.u32 4294901760, %v724_v16 }
  0x24   : > { %314 = vadd.xlane.f32.xlu1 %v2234_v3  ;;  %v337_v34 = vsel %vm336_vm1, %v2041_v9, %v335_v26  ;;  %535 = vmatpush.msrb.mxu1 %v398_v17  ;;  %v722_v26 = vld [vmem:[%s2843_s3 + $0x68] sm:$0xff] }
  0x25   : > { %600 = vmatpush.msrb.mxu3 %v599_v5 }
  0x8d   : > { %v309_v22 = vpop.xlane.xlu0 %308 }
  0x8e   : > { %v2244_v23 = vmul.f32 %v322_v18, %v309_v22  ;;  %v723_v22 = vld [vmem:[%s2843_s3 + $0x70] sm:$0xff] }
  0x8f   : > { %v313_v27 = vpop.xlane.xlu1 %312  ;;  %v2291_v29 = vand.u32 4294901760, %v723_v22 }
  0x90   : > { %v325_v28 = vmul.f32 128.0, %v2244_v23  ;;  %v543_v11 = vperm.slane %v2244_v23, %v373_v59 }
  0x92   : > { %v327_v31 = vmul.f32 %v325_v28, %v2244_v23 }
  0x94   : > { %v329_v35 = vsub.f32 %v313_v27, %v327_v31  ;;  %v2294_v31 = vsub.f32 %v724_v16, %v2281_v21  ;;  %v715_v16 = vld [vmem:[%s2843_s3 + $0x30] sm:$0xff] }
  0x95   : > { %v311_v36 = vpop.xlane.xlu0 %310 }
  0x96   : > { %v338_v37 = vmul.f32 %v337_v34, %v329_v35  ;;  %v324_v38 = vmul.f32 %v322_v18, %v311_v36 }
  0x97   : > { %v315_v41 = vpop.xlane.xlu1 %314 }
  0x98   : > { %v340_v39 = vmax.f32 %v338_v37, 0.0  ;;  %v326_v40 = vmul.f32 128.0, %v324_v38  ;;  %v544_v9 = vperm.slane %v324_v38, %v375_v63  ;;  %v2303_v37 = vsub.f32 %v723_v22, %v2291_v29 }
  0x9a   : > { %2042 = vrsqrt.f32 %v340_v39  ;;  %v328_v42 = vmul.f32 %v326_v40, %v324_v38  ;;  %v545_v14 = vsel %vm377_vm2, %v544_v9, %v543_v11  ;;  %vm349_vm4 = vcmp.eq.f32.partialorder %v340_v39, inf  ;;  %v721_v40 = vld [vmem:[%s2843_s3 + $0x60] sm:$0xff] }
  0x9b   : > { %v352_v19 = vand.u32 2147483648, %v340_v39  ;;  %v546_v20 = vsel %vm379_vm3, %v545_v14, 0  ;;  %vm351_vm5 = vcmp.eq.f32.partialorder %v340_v39, 0.0  ;;  %v2324_v47 = vand.u32 4294901760, %v2303_v37 }
  0x9c   : > { %v330_v43 = vsub.f32 %v315_v41, %v328_v42  ;;  %v2289_v28 = vand.u32 4294901760, %v546_v20 }
  0x9d   : > { %v784_v62 = vsub.f32 %v2303_v37, %v2324_v47 }
  0x9e   : > { %v339_v46 = vmul.f32 %v337_v34, %v330_v43  ;;  %v2296_v34 = vand.u32 4294901760, %v722_v26  ;;  %v2300_v36 = vsub.f32 %v546_v20, %v2289_v28  ;;  %v720_v43 = vld [vmem:[%s2843_s3 + $0x58] sm:$0xff] }
  0x9f   : > { %v2334_v57 = vand.u32 4294901760, %v720_v43 }
  0xa0   : > { %v2043_v50 = vpop.eup %2042  ;;  %v341_v51 = vmax.f32 %v339_v46, 0.0  ;;  %v2315_v42 = vsub.f32 %v722_v26, %v2296_v34  ;;  %v568_v46 = vand.u32 4294901760, %v2300_v36 }
  0xa1   : > { %v343_v53 = vmul.f32 %v2043_v50, %v340_v39 }
  0xa2   : > { %2044 = vrsqrt.f32 %v341_v51  ;;  %vm361_vm6 = vcmp.eq.f32.partialorder %v341_v51, inf  ;;  %v364_v25 = vand.u32 2147483648, %v341_v51  ;;  %vm363_vm7 = vcmp.eq.f32.partialorder %v341_v51, 0.0 }
  0xa3   : > { %v344_v56 = vmul.f32 %v2043_v50, %v343_v53  ;;  %v569_v61 = vsub.f32 %v2300_v36, %v568_v46 }
  0xa5   : > { %v345_v60 = vmul.f32 0.5, %v344_v56  ;;  %v2332_v56 = vand.u32 4294901760, %v2315_v42 }
  0xa7   : > { %v346_v4 = vsub.f32 1.5, %v345_v60 }
  0xa8   : > { %v2045_v6 = vpop.eup %2044 }
  0xa9   : > { %v355_v7 = vmul.f32 %v2045_v6, %v341_v51  ;;  %v347_v8 = vmul.f32 %v2043_v50, %v346_v4  ;;  %v2326_v50 = vand.u32 4294901760, %v721_v40  ;;  %v718_v4 = vld [vmem:[%s2843_s3 + $0x48] sm:$0xff] }
  0xaa   : > { %v2364_v9 = vand.u32 4294901760, %v718_v4 }
  0xab   : > { %v356_v10 = vmul.f32 %v2045_v6, %v355_v7  ;;  %v348_v12 = vmul.f32 %v347_v8, %v340_v39  ;;  %v790_v7 = vsub.f32 %v2315_v42, %v2332_v56  ;;  %v2361_v8 = vsub.f32 %v720_v43, %v2334_v57 }
  0xad   : > { %v357_v13 = vmul.f32 0.5, %v356_v10  ;;  %v350_v17 = vsel %vm349_vm4, %v340_v39, %v348_v12  ;;  %v2307_v39 = vand.u32 4294901760, %v2294_v31  ;;  %v2370_v10 = vand.u32 4294901760, %v784_v62  ;;  %v716_v12 = vld [vmem:[%s2843_s3 + $0x38] sm:$0xff] }
  0xae   : > { %v353_v24 = vsel %vm351_vm5, %v352_v19, %v350_v17  ;;  %v2386_v14 = vand.u32 4294901760, %v2361_v8  ;;  %v714_v19 = vld [vmem:[%s2843_s3 + $0x28] sm:$0xff] }
  0xaf   : > { %v358_v15 = vsub.f32 1.5, %v357_v13  ;;  %v374_v32 = vperm.slane %v353_v24, %v373_v59  ;;  %v719_v59 = vld [vmem:[%s2843_s3 + $0x50] sm:$0xff]  ;;  %v2383_v13 = vand.u32 4294901760, %v790_v7 }
  0xb0   : > { %v2356_v5 = vand.u32 4294901760, %v719_v59  ;;  %v802_v20 = vsub.f32 %v2361_v8, %v2386_v14 }
  0xb1   : > { %v359_v18 = vmul.f32 %v2045_v6, %v358_v15 }
  0xb3   : > { %v360_v23 = vmul.f32 %v359_v18, %v341_v51  ;;  %v2402_v18 = vand.u32 4294901760, %v716_v12 }
  0xb5   : > { %v362_v27 = vsel %vm361_vm6, %v341_v51, %v360_v23  ;;  %v778_v51 = vsub.f32 %v2294_v31, %v2307_v39  ;;  %v2418_v23 = vand.u32 4294901760, %v715_v16 }
  0xb6   : > { %v365_v30 = vsel %vm363_vm7, %v364_v25, %v362_v27  ;;  %v713_v25 = vld [vmem:[%s2843_s3 + $0x20] sm:$0xff]  ;;  %v2432_v27 = vsub.f32 %v716_v12, %v2402_v18 }
  0xb7   : > { %v376_v33 = vperm.slane %v365_v30, %v375_v63  ;;  %v2346_v63 = vsub.f32 %v721_v40, %v2326_v50  ;;  %v2434_v30 = vand.u32 4294901760, %v714_v19  ;;  %v2451_v40 = vsub.f32 %v715_v16, %v2418_v23  ;;  %v709_v16 = vld [vmem:[%s2843_s3] sm:$0xff] }
  0xb8   : > { %2860 = vst [vmem:[#allocation6_spill] sm:$0xff] %v2432_v27 }
  0xb9   : > { %v378_v35 = vsel %vm377_vm2, %v376_v33, %v374_v32  ;;  %v2373_v11 = vand.u32 4294901760, %v2346_v63  ;;  %v712_v33 = vld [vmem:[%s2843_s3 + $0x18] sm:$0xff]  ;;  %2861 = vst [vmem:[#allocation7_spill] sm:$0xff] %v2451_v40 }
  0xba   : > { %v380_v38 = vsel %vm379_vm3, %v378_v35, 0  ;;  %v2445_v35 = vand.u32 4294901760, %v802_v20 }
  0xbb   : > { %v2312_v41 = vand.u32 4294901760, %v380_v38  ;;  %v796_v17 = vsub.f32 %v2346_v63, %v2373_v11 }
  0xbd   : > { %436 = vmatmul.f32.vlgmr.msra.gmra.mxu1 %v2312_v41  ;;  %v401_v44 = vsub.f32 %v380_v38, %v2312_v41  ;;  %v2429_v26 = vand.u32 4294901760, %v796_v17 }
  0xbe   : > { %647 = vmatpush.msra.mxu1 %v2251_v45 }
  0xbf   : > { %462 = vmatmul.f32.vlgmr.msra.gmra.mxu2 %v401_v44  ;;  %v402_v53 = vand.u32 4294901760, %v401_v44 }
  0xc0   : > { %674 = vmatpush.msra.mxu2 %v591_v54  ;;  %649 = vmatpush.msra.mxu1 %v2257_v48  ;;  %v2354_v54 = vand.u32 4294901760, %v778_v51  ;;  %v2468_v51 = vsub.f32 %v714_v19, %v2434_v30 }
  0xc1   : > { %487 = vmatmul.f32.vlgmr.msra.gmra.mxu3 %v402_v53  ;;  %v403_v60 = vsub.f32 %v401_v44, %v402_v53  ;;  %v711_v44 = vld [vmem:[%s2843_s3 + $0x10] sm:$0xff]  ;;  %v2470_v53 = vand.u32 4294901760, %v712_v33 }
  0xc2   : > { %678 = vmatpush.msra.mxu2 %v597_v58  ;;  %699 = vmatpush.msra.mxu3 %v2251_v45  ;;  %v717_v58 = vld [vmem:[%s2843_s3 + $0x40] sm:$0xff]  ;;  %v570_v45 = vand.u32 4294901760, %v569_v61  ;;  %2862 = vst [vmem:[#allocation8_spill] sm:$0xff] %v2468_v51  ;;  %v2484_v61 = vand.u32 4294901760, %v2451_v40 }
  0xc3   : > { %v404_v6 = vand.u32 4294901760, %v403_v60  ;;  %v2388_v15 = vand.u32 4294901760, %v717_v58 }
  0xc4   : > { %701 = vmatpush.msra.mxu3 %v2257_v48  ;;  %v2378_v48 = vsub.f32 %v719_v59, %v2356_v5  ;;  %v832_v17 = vsub.f32 %v2451_v40, %v2484_v61 }
  0xc5   : > { %405 = vmatmul.f32.vlgmr.msra.gmra.mxu0 %v404_v6  ;;  %537 = vmatmul.f32.vlgmr.msrb.gmra.mxu1 %v2312_v41  ;;  %v2416_v22 = vsub.f32 %v717_v58, %v2388_v15  ;;  %v2500_v58 = vand.u32 4294901760, %v2468_v51 }
  0xc6   : > { %622 = vmatpush.msra.mxu0 %v2260_v49  ;;  %780 = vmatpush.msrb.mxu1 %v2354_v54  ;;  %v2393_v49 = vsub.f32 %v718_v4, %v2364_v9  ;;  %v2489_v4 = vand.u32 4294901760, %v711_v44 }
  0xc7   : > { %571 = vmatmul.f32.vlgmr.msrb.gmra.mxu2 %v570_v45  ;;  %2859 = vst [vmem:[#allocation5_spill] sm:$0xff] %v2416_v22  ;;  %v2448_v38 = vand.u32 4294901760, %v2416_v22  ;;  %v2503_v45 = vsub.f32 %v712_v33, %v2470_v53  ;;  %v838_v33 = vsub.f32 %v2468_v51, %v2500_v58 }
  0xc8   : > { %882 = vmatpush.msrb.mxu2 %v2294_v31  ;;  %625 = vmatpush.msra.mxu0 %v2265_v55  ;;  %v2407_v55 = vand.u32 4294901760, %v2378_v48  ;;  %v2423_v24 = vand.u32 4294901760, %v2393_v49  ;;  %v2522_v20 = vsub.f32 %v711_v44, %v2489_v4 }
  0xc9   : > { %602 = vmatmul.f32.vlgmr.msrb.gmra.mxu3 %v2289_v28  ;;  %786 = vmatpush.msrb.mxu1 %v2370_v10  ;;  %v820_v60 = vsub.f32 %v2416_v22, %v2448_v38  ;;  %2864 = vst [vmem:[#allocation10_spill] sm:$0xff] %v2503_v45 }
  0xca   : > { %885 = vmatpush.msrb.mxu2 %v2303_v37  ;;  %940 = vmatpush.msrb.mxu3 %v2281_v21  ;;  %v808_v32 = vsub.f32 %v2378_v48, %v2407_v55  ;;  %v814_v43 = vsub.f32 %v2393_v49, %v2423_v24  ;;  %2865 = vst [vmem:[#allocation11_spill] sm:$0xff] %v2522_v20  ;;  %v2549_v52 = vand.u32 4294901760, %v2522_v20 }
  0xcb   : > { %792 = vmatpush.msrb.mxu1 %v2383_v13 }
  0xcc   : > { %888 = vmatpush.msrb.mxu2 %v2315_v42  ;;  %942 = vmatpush.msrb.mxu3 %v2291_v29  ;;  %v2474_v59 = vand.u32 4294901760, %v808_v32  ;;  %v2493_v6 = vand.u32 4294901760, %v814_v43  ;;  %v2535_v43 = vand.u32 4294901760, %v2503_v45 }
  0xcd   : > { %514 = vmatmul.f32.vlgmr.msrb.gmra.mxu0 %v2312_v41  ;;  %653 = vmatmul.f32.vlgmr.msra.gmra.mxu1 %v568_v46  ;;  %v2453_v41 = vand.u32 4294901760, %v713_v25  ;;  %v2465_v46 = vand.u32 4294901760, %v2432_v27 }
  0xce   : > { %727 = vmatpush.msrb.mxu0 %v2281_v21  ;;  %891 = vmatpush.msrb.mxu2 %v2346_v63 }
  0xcf   : > { %680 = vmatmul.f32.vlgmr.msra.gmra.mxu2 %v2289_v28  ;;  %944 = vmatpush.msrb.mxu3 %v2296_v34  ;;  %v2487_v62 = vsub.f32 %v713_v25, %v2453_v41  ;;  %v826_v7 = vsub.f32 %v2432_v27, %v2465_v46  ;;  %v2526_v25 = vand.u32 4294901760, %v709_v16 }
  0xd0   : > { %729 = vmatpush.msrb.mxu0 %v2291_v29  ;;  %894 = vmatpush.msrb.mxu2 %v2361_v8 }
  0xd1   : > { %703 = vmatmul.f32.vlgmr.msra.gmra.mxu3 %v2289_v28  ;;  %798 = vmatpush.msrb.mxu1 %v2429_v26  ;;  %v710_v28 = vld [vmem:[%s2843_s3 + $0x8] sm:$0xff]  ;;  %2863 = vst [vmem:[#allocation9_spill] sm:$0xff] %v2487_v62  ;;  %v2519_v19 = vand.u32 4294901760, %v2487_v62  ;;  %v2530_v32 = vand.u32 4294901760, %v826_v7 }
  0xd2   : > { %731 = vmatpush.msrb.mxu0 %v2296_v34  ;;  %946 = vmatpush.msrb.mxu3 %v2326_v50  ;;  %v2505_v12 = vand.u32 4294901760, %v710_v28 }
  0xd3   : > { %897 = vmatpush.msrb.mxu2 %v2378_v48  ;;  %804 = vmatpush.msrb.mxu1 %v2445_v35  ;;  %v844_v7 = vsub.f32 %v2487_v62, %v2519_v19 }
  0xd4   : > { %733 = vmatpush.msrb.mxu0 %v2326_v50  ;;  %948 = vmatpush.msrb.mxu3 %v2334_v57  ;;  %v2538_v44 = vsub.f32 %v710_v28, %v2505_v12  ;;  %v2554_v28 = vsub.f32 %v709_v16, %v2526_v25 }
  0xd5   : > { %628 = vmatmul.f32.vlgmr.msra.gmra.mxu0 %v2300_v36  ;;  %900 = vmatpush.msrb.mxu2 %v2393_v49  ;;  %v2514_v36 = vand.u32 4294901760, %v820_v60  ;;  %v2544_v60 = vand.u32 4294901760, %v832_v17  ;;  %v850_v17 = vsub.f32 %v2503_v45, %v2535_v43  ;;  %v2569_v16 = vand.u32 4294901760, %v844_v7 }
  0xd6   : > { %735 = vmatpush.msrb.mxu0 %v2334_v57  ;;  %950 = vmatpush.msrb.mxu3 %v2356_v5 }
  0xd7   : > { %810 = vmatpush.msrb.mxu1 %v2474_v59  ;;  %903 = vmatpush.msrb.mxu2 %v2416_v22  ;;  %v2580_v22 = vand.u32 4294901760, %v850_v17 }
  0xd8   : > { %737 = vmatpush.msrb.mxu0 %v2356_v5  ;;  %952 = vmatpush.msrb.mxu3 %v2364_v9 }
  0xd9   : > { %816 = vmatpush.msrb.mxu1 %v2493_v6  ;;  %906 = vmatpush.msrb.mxu2 %v2432_v27  ;;  %v2563_v27 = vand.u32 4294901760, %v2538_v44 }
  0xda   : > { %739 = vmatpush.msrb.mxu0 %v2364_v9  ;;  %954 = vmatpush.msrb.mxu3 %v2388_v15 }
  0xdb   : > { %822 = vmatpush.msrb.mxu1 %v2514_v36  ;;  %909 = vmatpush.msrb.mxu2 %v2451_v40  ;;  %v2558_v40 = vand.u32 4294901760, %v838_v33  ;;  %v856_v33 = vsub.f32 %v2522_v20, %v2549_v52  ;;  %v862_v7 = vsub.f32 %v2538_v44, %v2563_v27 }
  0xdc   : > { %741 = vmatpush.msrb.mxu0 %v2388_v15  ;;  %956 = vmatpush.msrb.mxu3 %v2402_v18 }
  0xdd   : > { %828 = vmatpush.msrb.mxu1 %v2530_v32  ;;  %912 = vmatpush.msrb.mxu2 %v2468_v51  ;;  %v2576_v51 = vand.u32 4294901760, %v2554_v28 }
  0xde   : > { %743 = vmatpush.msrb.mxu0 %v2402_v18  ;;  %958 = vmatpush.msrb.mxu3 %v2418_v23 }
  0xdf   : > { %834 = vmatpush.msrb.mxu1 %v2544_v60  ;;  %915 = vmatpush.msrb.mxu2 %v2487_v62  ;;  %v2588_v62 = vand.u32 4294901760, %v856_v33  ;;  %v868_v17 = vsub.f32 %v2554_v28, %v2576_v51  ;;  %v2603_v33 = vand.u32 4294901760, %v2221_v0 }
  0xe0   : > { %745 = vmatpush.msrb.mxu0 %v2418_v23  ;;  %960 = vmatpush.msrb.mxu3 %v2434_v30 }
  0xe1   : > { %840 = vmatpush.msrb.mxu1 %v2558_v40  ;;  %918 = vmatpush.msrb.mxu2 %v2503_v45  ;;  %v2596_v45 = vand.u32 4294901760, %v862_v7  ;;  %v759_v7 = vsub.f32 %v2221_v0, %v2603_v33 }
  0xe2   : > { %747 = vmatpush.msrb.mxu0 %v2434_v30  ;;  %962 = vmatpush.msrb.mxu3 %v2453_v41 }
  0xe3   : > { %846 = vmatpush.msrb.mxu1 %v2569_v16  ;;  %921 = vmatpush.msrb.mxu2 %v2522_v20  ;;  %v2607_v20 = vand.u32 4294901760, %v868_v17  ;;  %v760_v0 = vand.u32 4294901760, %v759_v7 }
  0xe4   : > { %749 = vmatpush.msrb.mxu0 %v2453_v41  ;;  %964 = vmatpush.msrb.mxu3 %v2470_v53 }
  0xe5   : > { %852 = vmatpush.msrb.mxu1 %v2580_v22  ;;  %924 = vmatpush.msrb.mxu2 %v2538_v44 }
  0xe6   : > { %751 = vmatpush.msrb.mxu0 %v2470_v53  ;;  %966 = vmatpush.msrb.mxu3 %v2489_v4 }
  0xe7   : > { %858 = vmatpush.msrb.mxu1 %v2588_v62  ;;  %927 = vmatpush.msrb.mxu2 %v2554_v28 }
  0xe8   : > { %753 = vmatpush.msrb.mxu0 %v2489_v4  ;;  %968 = vmatpush.msrb.mxu3 %v2505_v12 }
  0xe9   : > { %1099 = vmatpush.msra.mxu2 %v2281_v21  ;;  %864 = vmatpush.msrb.mxu1 %v2596_v45 }
  0xea   : > { %755 = vmatpush.msrb.mxu0 %v2505_v12  ;;  %970 = vmatpush.msrb.mxu3 %v2526_v25 }
  0xeb   : > { %1101 = vmatpush.msra.mxu2 %v2291_v29  ;;  %870 = vmatpush.msrb.mxu1 %v2607_v20 }
  0xec   : > { %1152 = vmatpush.msra.mxu3 %v2354_v54  ;;  %757 = vmatpush.msrb.mxu0 %v2526_v25  ;;  %v2628_v54 = vand.u32 4294901760, %v2230_v2 }
  0xed   : > { %1058 = vmatpush.msra.mxu1 %v2281_v21  ;;  %1103 = vmatpush.msra.mxu2 %v2296_v34 }
  0xee   : > { %987 = vmatpush.msra.mxu0 %v2307_v39  ;;  %1158 = vmatpush.msra.mxu3 %v2370_v10  ;;  %v761_v10 = vsub.f32 %v759_v7, %v760_v0 }
  0xef   : > { %1060 = vmatpush.msra.mxu1 %v2291_v29  ;;  %1105 = vmatpush.msra.mxu2 %v2326_v50 }
  0xf0   : > { %991 = vmatpush.msra.mxu0 %v2324_v47  ;;  %1164 = vmatpush.msra.mxu3 %v2383_v13  ;;  %v767_v13 = vsub.f32 %v2230_v2, %v2628_v54 }
  0xf1   : > { %1062 = vmatpush.msra.mxu1 %v2296_v34  ;;  %1107 = vmatpush.msra.mxu2 %v2334_v57 }
  0xf2   : > { %995 = vmatpush.msra.mxu0 %v2332_v56  ;;  %1170 = vmatpush.msra.mxu3 %v2429_v26  ;;  %v762_v26 = vand.u32 4294901760, %v761_v10 }
  0xf3   : > { %1064 = vmatpush.msra.mxu1 %v2326_v50  ;;  %1109 = vmatpush.msra.mxu2 %v2356_v5 }
  0xf4   : > { %999 = vmatpush.msra.mxu0 %v2373_v11  ;;  %1176 = vmatpush.msra.mxu3 %v2445_v35  ;;  %v768_v35 = vand.u32 4294901760, %v767_v13 }
  0xf5   : > { %1066 = vmatpush.msra.mxu1 %v2334_v57  ;;  %1111 = vmatpush.msra.mxu2 %v2364_v9 }
  0xf6   : > { %1003 = vmatpush.msra.mxu0 %v2386_v14  ;;  %1182 = vmatpush.msra.mxu3 %v2474_v59  ;;  %v769_v2 = vsub.f32 %v767_v13, %v768_v35 }
  0xf7   : > { %1068 = vmatpush.msra.mxu1 %v2356_v5  ;;  %1113 = vmatpush.msra.mxu2 %v2388_v15 }
  0xf8   : > { %1007 = vmatpush.msra.mxu0 %v2407_v55  ;;  %1188 = vmatpush.msra.mxu3 %v2493_v6  ;;  %v770_v59 = vand.u32 4294901760, %v769_v2 }
  0xf9   : > { %1070 = vmatpush.msra.mxu1 %v2364_v9  ;;  %1115 = vmatpush.msra.mxu2 %v2402_v18 }
  0xfa   : > { %1011 = vmatpush.msra.mxu0 %v2423_v24  ;;  %1194 = vmatpush.msra.mxu3 %v2514_v36 }
  0xfb   : > { %1072 = vmatpush.msra.mxu1 %v2388_v15  ;;  %763 = vmatmul.f32.vlgmr.msrb.gmra.mxu0 %v762_v26 }
  0xfc   : > { %1015 = vmatpush.msra.mxu0 %v2448_v38  ;;  %1117 = vmatpush.msra.mxu2 %v2418_v23 }
  0xfd   : > { %1200 = vmatpush.msra.mxu3 %v2530_v32  ;;  %872 = vmatmul.f32.vlgmr.msrb.gmra.mxu1 %v2603_v33 }
  0xfe   : > { %1019 = vmatpush.msra.mxu0 %v2465_v46  ;;  %1119 = vmatpush.msra.mxu2 %v2434_v30 }
  0xff   : > { %1074 = vmatpush.msra.mxu1 %v2402_v18  ;;  %1206 = vmatpush.msra.mxu3 %v2544_v60 }
 0x100   : > { %1023 = vmatpush.msra.mxu0 %v2484_v61  ;;  %1121 = vmatpush.msra.mxu2 %v2453_v41 }
 0x101   : > { %1076 = vmatpush.msra.mxu1 %v2418_v23  ;;  %1212 = vmatpush.msra.mxu3 %v2558_v40  ;;  %v2681_v40 = vand.u32 4294901760, %v2226_v1 }
 0x102   : > { %1027 = vmatpush.msra.mxu0 %v2500_v58  ;;  %930 = vmatmul.f32.vlgmr.msrb.gmra.mxu2 %v759_v7 }
 0x103   : > { %1078 = vmatpush.msra.mxu1 %v2434_v30  ;;  %1123 = vmatpush.msra.mxu2 %v2470_v53 }
 0x104   : > { %1031 = vmatpush.msra.mxu0 %v2519_v19  ;;  %1218 = vmatpush.msra.mxu3 %v2569_v16 }
 0x105   : > { %771 = vmatmul.f32.gmra.mxu0 %v770_v59  ;;  %974 = vmatmul.f32.vlgmr.msrb.gmra.mxu3 %v760_v0 }
 0x106   : > { %1035 = vmatpush.msra.mxu0 %v2535_v43  ;;  %1080 = vmatpush.msra.mxu1 %v2453_v41 }
 0x107   : > { %1125 = vmatpush.msra.mxu2 %v2489_v4  ;;  %1224 = vmatpush.msra.mxu3 %v2580_v22  ;;  %v2692_v22 = vsub.f32 %v2226_v1, %v2681_v40 }
 0x108   : > { %876 = vmatmul.f32.gmra.mxu1 %v2628_v54  ;;  %1039 = vmatpush.msra.mxu0 %v2549_v52 }
 0x109   : > { %1082 = vmatpush.msra.mxu1 %v2470_v53  ;;  %1127 = vmatpush.msra.mxu2 %v2505_v12  ;;  %v1132_v1 = vand.u32 4294901760, %v2692_v22 }
 0x10a   : > { %1230 = vmatpush.msra.mxu3 %v2588_v62  ;;  %1043 = vmatpush.msra.mxu0 %v2563_v27 }
 0x10b   : > { %1084 = vmatpush.msra.mxu1 %v2489_v4  ;;  %1129 = vmatpush.msra.mxu2 %v2526_v25 }
 0x10c   : > { %1236 = vmatpush.msra.mxu3 %v2596_v45  ;;  %935 = vmatmul.f32.gmra.mxu2 %v767_v13 }
 0x10d   : > { %1359 = vmatpush.msrb.mxu2 %v2307_v39  ;;  %1047 = vmatpush.msra.mxu0 %v2576_v51  ;;  %v2705_v39 = vand.u32 4294901760, %v2234_v3 }
 0x10e   : > { %1086 = vmatpush.msra.mxu1 %v2505_v12  ;;  %1242 = vmatpush.msra.mxu3 %v2607_v20 }
 0x10f   : > { %980 = vmatmul.f32.gmra.mxu3 %v768_v35  ;;  %1049 = vmatmul.f32.vlgmr.msra.gmra.mxu0 %v2603_v33 }
 0x110   : > { %1254 = vmatpush.msrb.mxu0 %v2294_v31  ;;  %1363 = vmatpush.msrb.mxu2 %v2324_v47  ;;  %v2868_v47 = vld [vmem:[#allocation7_spill] sm:$0xff] }
 0x111   : > { %1430 = vmatpush.msrb.mxu3 %v2281_v21  ;;  %1088 = vmatpush.msra.mxu1 %v2526_v25 }
 0x112   : > { %1090 = vmatmul.f32.vlgmr.msra.gmra.mxu1 %v2603_v33  ;;  %1257 = vmatpush.msrb.mxu0 %v2303_v37 }
 0x113   : > { %1312 = vmatpush.msrb.mxu1 %v2281_v21  ;;  %1367 = vmatpush.msrb.mxu2 %v2332_v56  ;;  %v1133_v21 = vsub.f32 %v2692_v22, %v1132_v1  ;;  %v2869_v56 = vld [vmem:[#allocation8_spill] sm:$0xff] }
 0x114   : > { %1432 = vmatpush.msrb.mxu3 %v2291_v29  ;;  %1260 = vmatpush.msrb.mxu0 %v2315_v42  ;;  %v2867_v42 = vld [vmem:[#allocation6_spill] sm:$0xff] }
 0x115   : > { %1314 = vmatpush.msrb.mxu1 %v2291_v29  ;;  %1371 = vmatpush.msrb.mxu2 %v2373_v11  ;;  %v2722_v29 = vsub.f32 %v2234_v3, %v2705_v39  ;;  %v1134_v31 = vand.u32 4294901760, %v1133_v21 }
 0x116   : > { %1434 = vmatpush.msrb.mxu3 %v2296_v34  ;;  %1263 = vmatpush.msrb.mxu0 %v2346_v63  ;;  %v2871_v63 = vld [vmem:[#allocation10_spill] sm:$0xff] }
 0x117   : > { %1316 = vmatpush.msrb.mxu1 %v2296_v34  ;;  %1375 = vmatpush.msrb.mxu2 %v2386_v14  ;;  %v1140_v3 = vand.u32 4294901760, %v2722_v29  ;;  %v2866_v34 = vld [vmem:[#allocation5_spill] sm:$0xff] }
 0x118   : > { %1436 = vmatpush.msrb.mxu3 %v2326_v50  ;;  %1053 = vmatmul.f32.gmra.mxu0 %v2628_v54 }
 0x119   : > { %1266 = vmatpush.msrb.mxu0 %v2361_v8  ;;  %1318 = vmatpush.msrb.mxu1 %v2326_v50  ;;  %v1141_v37 = vsub.f32 %v2722_v29, %v1140_v3 }
 0x11a   : > { %1379 = vmatpush.msrb.mxu2 %v2407_v55  ;;  %1438 = vmatpush.msrb.mxu3 %v2334_v57 }
 0x11b   : > { %1094 = vmatmul.f32.gmra.mxu1 %v2628_v54  ;;  %1269 = vmatpush.msrb.mxu0 %v2378_v48  ;;  %v1142_v50 = vand.u32 4294901760, %v1141_v37 }
 0x11c   : > { %1320 = vmatpush.msrb.mxu1 %v2334_v57  ;;  %1383 = vmatpush.msrb.mxu2 %v2423_v24  ;;  %v2870_v57 = vld [vmem:[#allocation9_spill] sm:$0xff] }
 0x11d   : > { %1440 = vmatpush.msrb.mxu3 %v2356_v5  ;;  %1272 = vmatpush.msrb.mxu0 %v2393_v49 }
 0x11e   : > { %1322 = vmatpush.msrb.mxu1 %v2356_v5  ;;  %1387 = vmatpush.msrb.mxu2 %v2448_v38  ;;  %v2872_v5 = vld [vmem:[#allocation11_spill] sm:$0xff] }
 0x11f   : > { %1442 = vmatpush.msrb.mxu3 %v2364_v9  ;;  %1135 = vmatmul.f32.vlgmr.msra.gmra.mxu2 %v1134_v31 }
 0x120   : > { %1244 = vmatmul.f32.vlgmr.msra.gmra.mxu3 %v2681_v40  ;;  %1275 = vmatpush.msrb.mxu0 %v2866_v34 }
 0x121   : > { %1324 = vmatpush.msrb.mxu1 %v2364_v9  ;;  %1391 = vmatpush.msrb.mxu2 %v2465_v46 }
 0x122   : > { %1444 = vmatpush.msrb.mxu3 %v2388_v15  ;;  %1278 = vmatpush.msrb.mxu0 %v2867_v42 }
 0x123   : > { %1326 = vmatpush.msrb.mxu1 %v2388_v15  ;;  %1395 = vmatpush.msrb.mxu2 %v2484_v61 }
 0x124   : > { %1446 = vmatpush.msrb.mxu3 %v2402_v18  ;;  %1281 = vmatpush.msrb.mxu0 %v2868_v47 }
 0x125   : > { %1328 = vmatpush.msrb.mxu1 %v2402_v18  ;;  %1399 = vmatpush.msrb.mxu2 %v2500_v58 }
 0x126   : > { %1448 = vmatpush.msrb.mxu3 %v2418_v23  ;;  %1284 = vmatpush.msrb.mxu0 %v2869_v56 }
 0x127   : > { %1330 = vmatpush.msrb.mxu1 %v2418_v23  ;;  %1403 = vmatpush.msrb.mxu2 %v2519_v19 }
 0x128   : > { %1450 = vmatpush.msrb.mxu3 %v2434_v30  ;;  %1143 = vmatmul.f32.gmra.mxu2 %v1142_v50 }
 0x129   : > { %1248 = vmatmul.f32.gmra.mxu3 %v2705_v39  ;;  %1287 = vmatpush.msrb.mxu0 %v2870_v57 }
 0x12a   : > { %1332 = vmatpush.msrb.mxu1 %v2434_v30  ;;  %1407 = vmatpush.msrb.mxu2 %v2535_v43 }
 0x12b   : > { %1452 = vmatpush.msrb.mxu3 %v2453_v41  ;;  %1290 = vmatpush.msrb.mxu0 %v2871_v63 }
 0x12c   : > { %1334 = vmatpush.msrb.mxu1 %v2453_v41  ;;  %1411 = vmatpush.msrb.mxu2 %v2549_v52  ;;  %v2873_v52 = vlaneseq }
 0x12d   : > { %1454 = vmatpush.msrb.mxu3 %v2470_v53  ;;  %1293 = vmatpush.msrb.mxu0 %v2872_v5 }
 0x12e   : > { %1336 = vmatpush.msrb.mxu1 %v2470_v53  ;;  %1415 = vmatpush.msrb.mxu2 %v2563_v27  ;;  %v1883_v8 = vshrl.u32 %v2873_v52, 7 }
 0x12f   : > { %1456 = vmatpush.msrb.mxu3 %v2489_v4  ;;  %1296 = vmatpush.msrb.mxu0 %v2538_v44 }
 0x130   : > { %1338 = vmatpush.msrb.mxu1 %v2489_v4  ;;  %1419 = vmatpush.msrb.mxu2 %v2576_v51  ;;  %v1890_v9 = vadd.s32 8, %v1883_v8 }
 0x131   : > { %1458 = vmatpush.msrb.mxu3 %v2505_v12  ;;  %1421 = vmatmul.f32.vlgmr.msrb.gmra.mxu2 %v2681_v40 }
 0x132   : > { %1299 = vmatpush.msrb.mxu0 %v2554_v28  ;;  %1340 = vmatpush.msrb.mxu1 %v2505_v12  ;;  %v707_v12 = vld [vmem:[%s2847_s7] sm:$0x1] }
 0x133   : > { %1460 = vmatpush.msrb.mxu3 %v2526_v25  ;;  %1302 = vmatmul.f32.vlgmr.msrb.gmra.mxu0 %v2692_v22 }
 0x134   : > { %1462 = vmatmul.f32.vlgmr.msrb.gmra.mxu3 %v2681_v40  ;;  %1342 = vmatpush.msrb.mxu1 %v2526_v25  ;;  %v725_v25 = vld [vmem:[%s2844_s4] sm:$0xff] }
 0x135   : > { %1346 = vmatmul.f32.vlgmr.msrb.gmra.mxu1 %v1132_v1  ;;  %2033 = vset.pattern.permute.xlu2 %v1883_v8  ;;  %v1520_v32 = vand.u32 4294901760, %v725_v25 }
 0x136   : > { %2035 = vset.pattern.permute.xlu0 %v1890_v9 }
 0x137   : > { %v1555_v43 = vsub.f32 %v725_v25, %v1520_v32  ;;  %1614 = vmatpush.msra.mxu3 %v1520_v32  ;;  %1521 = vmatpush.msra.mxu0 %v1520_v32 }
 0x139   : > { %1425 = vmatmul.f32.gmra.mxu2 %v2705_v39  ;;  %v1556_v44 = vand.u32 4294901760, %v1555_v43 }
 0x13a   : > { %v437_v11 = vpop.f32.mrf.mxu1  ;;  %1586 = vmatpush.msra.mxu2 %v1555_v43 }
 0x13b   : > { %1307 = vmatmul.f32.gmra.mxu0 %v2722_v29  ;;  %v1557_v60 = vsub.f32 %v1555_v43, %v1556_v44 }
 0x13c   : > { %1466 = vmatmul.f32.gmra.mxu3 %v2705_v39  ;;  %1704 = vmatpush.msrb.mxu2 %v1520_v32 }
 0x13d   : > { %1352 = vmatmul.f32.gmra.mxu1 %v1140_v3  ;;  %1646 = vmatpush.msrb.mxu0 %v1556_v44  ;;  %v1558_v28 = vand.u32 4294901760, %v1557_v60 }
 0x13f   : > { %1559 = vmatpush.msra.mxu1 %v1558_v28  ;;  %1742 = vmatpush.msrb.mxu3 %v1558_v28 }
 0x141   : > { %1672 = vmatpush.msrb.mxu1 %v1520_v32 }
 0x142   : > { %v406_v48 = vpop.f32.mrf.mxu0  ;;  %v463_v14 = vpop.f32.mrf.mxu2 }
 0x143   : > { %v438_v15 = vadd.f32 %v437_v11, %v406_v48  ;;  %v538_v23 = vpop.f32.mrf.mxu1 }
 0x144   : > { %v488_v49 = vpop.f32.mrf.mxu3 }
 0x145   : > { %v464_v18 = vadd.f32 %v463_v14, %v438_v15 }
 0x147   : > { %v489_v55 = vadd.f32 %v488_v49, %v464_v18 }
 0x14a   : > { %v515_v24 = vpop.f32.mrf.mxu0  ;;  %v572_v30 = vpop.f32.mrf.mxu2 }
 0x14b   : > { %v516_v27 = vadd.f32 %v515_v24, %v489_v55  ;;  %v654_v62 = vpop.f32.mrf.mxu1 }
 0x14c   : > { %v603_v41 = vpop.f32.mrf.mxu3 }
 0x14d   : > { %v539_v38 = vadd.f32 %v538_v23, %v516_v27 }
 0x14f   : > { %v573_v46 = vadd.f32 %v572_v30, %v539_v38 }
 0x151   : > { %v604_v51 = vadd.f32 %v603_v41, %v573_v46 }
 0x152   : > { %v629_v53 = vpop.f32.mrf.mxu0  ;;  %v681_v6 = vpop.f32.mrf.mxu2 }
 0x153   : > { %v630_v61 = vadd.f32 %v629_v53, %v604_v51 }
 0x154   : > { %v704_v45 = vpop.f32.mrf.mxu3 }
 0x155   : > { %v655_v4 = vadd.f32 %v654_v62, %v630_v61 }
 0x157   : > { %v682_v58 = vadd.f32 %v681_v6, %v655_v4 }
 0x159   : > { %v705_v36 = vadd.f32 %v704_v45, %v682_v58 }
 0x15b   : > { %v708_v19 = vadd.f32 %v707_v12, %v705_v36 }
 0x15d   : > { %v1881_v20 = vperm.slane %v708_v19, 0 }
 0x15f   : > { %1886 = vperm.xlu2 %2033, %v1881_v20  }
 0x167   : > { %2034 = vset.pattern.permute.xlu2 %v1890_v9 }
 0x16f   : > { %1892 = vperm.xlu2 %2034, %v1881_v20  }
 0x178   : > { %v764_v16 = vpop.f32.mrf.mxu0 }
 0x17a   : > { %v873_v17 = vpop.f32.mrf.mxu1 }
 0x17b   : > { %v874_v33 = vadd.f32 %v873_v17, %v764_v16 }
 0x182   : > { %v772_v7 = vpop.f32.mrf.mxu0 }
 0x185   : > { %v877_v0 = vpop.f32.mrf.mxu1  ;;  %v931_v54 = vpop.f32.mrf.mxu2 }
 0x186   : > { %v932_v10 = vadd.f32 %v931_v54, %v874_v33  ;;  %v878_v35 = vadd.f32 %v877_v0, %v772_v7 }
 0x188   : > { %v975_v13 = vpop.f32.mrf.mxu3 }
 0x189   : > { %v976_v26 = vadd.f32 %v975_v13, %v932_v10 }
 0x18c   : > { %v1050_v2 = vpop.f32.mrf.mxu0 }
 0x18d   : > { %v1051_v59 = vadd.f32 %v1050_v2, %v976_v26 }
 0x18f   : > { %v1091_v40 = vpop.f32.mrf.mxu1  ;;  %v936_v22 = vpop.f32.mrf.mxu2 }
 0x190   : > { %v1092_v1 = vadd.f32 %v1091_v40, %v1051_v59  ;;  %v937_v39 = vadd.f32 %v936_v22, %v878_v35 }
 0x192   : > { %v1500_v21 = vsel %vm1498_vm8, %v1092_v1, 0  ;;  %v981_v29 = vpop.f32.mrf.mxu3  ;;  %v1470_v53 = vmul.f32 %v1092_v1, %v1092_v1 }
 0x193   : > { %v1522_v31 = vand.u32 4294901760, %v1500_v21  ;;  %v982_v3 = vadd.f32 %v981_v29, %v937_v39 }
 0x195   : > { %v1523_v34 = vsub.f32 %v1500_v21, %v1522_v31  ;;  %v1054_v37 = vpop.f32.mrf.mxu0  ;;  %1561 = vmatmul.f32.vlgmr.msra.gmra.mxu1 %v1522_v31 }
 0x196   : > { %v1055_v42 = vadd.f32 %v1054_v37, %v982_v3  ;;  %1797 = vmatpush.msra.mxu1 %v1520_v32 }
 0x197   : > { %1589 = vmatmul.f32.vlgmr.msra.gmra.mxu2 %v1523_v34  ;;  %v1524_v47 = vand.u32 4294901760, %v1523_v34 }
 0x198   : > { %v1095_v50 = vpop.f32.mrf.mxu1  ;;  %1829 = vmatpush.msra.mxu2 %v1556_v44 }
 0x199   : > { %v1096_v56 = vadd.f32 %v1095_v50, %v1055_v42  ;;  %1618 = vmatmul.f32.vlgmr.msra.gmra.mxu3 %v1524_v47  ;;  %v1525_v57 = vsub.f32 %v1523_v34, %v1524_v47 }
 0x19a   : > { %1855 = vmatpush.msra.mxu3 %v1520_v32 }
 0x19b   : > { %v1503_v63 = vsel %vm1498_vm8, %v1096_v56, 0  ;;  %v1526_v5 = vand.u32 4294901760, %v1525_v57  ;;  %v1471_v32 = vmul.f32 %v1096_v56, %v1096_v56 }
 0x19c   : > { %v1530_v52 = vand.u32 4294901760, %v1503_v63 }
 0x19d   : > { %1527 = vmatmul.f32.vlgmr.msra.gmra.mxu0 %v1526_v5 }
 0x19e   : > { %v1531_v8 = vsub.f32 %v1503_v63, %v1530_v52  ;;  %1565 = vmatmul.f32.gmra.mxu1 %v1530_v52  ;;  %1769 = vmatpush.msra.mxu0 %v1555_v43 }
 0x1a0   : > { %1594 = vmatmul.f32.gmra.mxu2 %v1531_v8  ;;  %v1532_v9 = vand.u32 4294901760, %v1531_v8 }
 0x1a2   : > { %v1136_v11 = vpop.f32.mrf.mxu2  ;;  %1624 = vmatmul.f32.gmra.mxu3 %v1532_v9  ;;  %v1533_v48 = vsub.f32 %v1531_v8, %v1532_v9 }
 0x1a3   : > { %v1245_v15 = vpop.f32.mrf.mxu3 }
 0x1a4   : > { %v1534_v14 = vand.u32 4294901760, %v1533_v48  ;;  %v1246_v18 = vadd.f32 %v1245_v15, %v1136_v11 }
 0x1a6   : > { %1535 = vmatmul.f32.gmra.mxu0 %v1534_v14  ;;  %1674 = vmatmul.f32.vlgmr.msrb.gmra.mxu1 %v1522_v31 }
 0x1ab   : > { %v1144_v49 = vpop.f32.mrf.mxu2 }
 0x1ac   : > { %v1249_v55 = vpop.f32.mrf.mxu3 }
 0x1ad   : > { %v1250_v46 = vadd.f32 %v1249_v55, %v1144_v49 }
 0x1ae   : > { %1648 = vmatmul.f32.vlgmr.msrb.gmra.mxu0 %v1522_v31  ;;  %1678 = vmatmul.f32.gmra.mxu1 %v1530_v52 }
 0x1b0   : > { %v1303_v23 = vpop.f32.mrf.mxu0 }
 0x1b1   : > { %v1304_v24 = vadd.f32 %v1303_v23, %v1246_v18 }
 0x1b2   : > { %v1347_v27 = vpop.f32.mrf.mxu1 }
 0x1b3   : > { %v1348_v30 = vadd.f32 %v1347_v27, %v1304_v24 }
 0x1b4   : > { %v1422_v38 = vpop.f32.mrf.mxu2 }
 0x1b5   : > { %v1423_v41 = vadd.f32 %v1422_v38, %v1348_v30 }
 0x1b6   : > { %1652 = vmatmul.f32.gmra.mxu0 %v1530_v52 }
 0x1b7   : > { %v1463_v51 = vpop.f32.mrf.mxu3 }
 0x1b8   : > { %v1464_v61 = vadd.f32 %v1463_v51, %v1423_v41  ;;  %v1308_v62 = vpop.f32.mrf.mxu0 }
 0x1b9   : > { %v1309_v4 = vadd.f32 %v1308_v62, %v1250_v46 }
 0x1ba   : > { %v1472_v6 = vsub.f32 %v1464_v61, %v1470_v53  ;;  %v1353_v58 = vpop.f32.mrf.mxu1 }
 0x1bb   : > { %v1354_v45 = vadd.f32 %v1353_v58, %v1309_v4 }
 0x1bc   : > { %v1474_v12 = vmax.f32 %v1472_v6, 0.0  ;;  %v1426_v36 = vpop.f32.mrf.mxu2 }
 0x1bd   : > { %v1427_v19 = vadd.f32 %v1426_v36, %v1354_v45 }
 0x1be   : > { %v1476_v20 = vadd.f32 1e-05, %v1474_v12 }
 0x1bf   : > { %v1467_v25 = vpop.f32.mrf.mxu3 }
 0x1c0   : > { %2046 = vrsqrt.f32 %v1476_v20  ;;  %v1468_v43 = vadd.f32 %v1467_v25, %v1427_v19  ;;  %vm1484_vm10 = vweird.f32 %v1476_v20 }
 0x1c2   : > { %v1473_v44 = vsub.f32 %v1468_v43, %v1471_v32  ;;  %v2050_v43 = vld [vmem:[%s2218_s21] sm:$0xff] }
 0x1c4   : > { %v1475_v60 = vmax.f32 %v1473_v44, 0.0 }
 0x1c6   : > { %v2047_v28 = vpop.eup %2046  ;;  %v1477_v16 = vadd.f32 1e-05, %v1475_v60 }
 0x1c7   : > { %v1479_v17 = vmul.f32 %v2047_v28, %v1476_v20  ;;  %vm1485_vm9 = vweird.f32 %v2047_v28 }
 0x1c8   : > { %2048 = vrsqrt.f32 %v1477_v16  ;;  %vm1486_vm11 = vmor %vm1484_vm10, %vm1485_vm9  ;;  %vm1494_vm13 = vweird.f32 %v1477_v16 }
 0x1c9   : > { %v1480_v33 = vmul.f32 %v2047_v28, %v1479_v17  ;;  %v2036_v17 = vld [vmem:[%s2841_s1] ss:$0 sm:$0xff] }
 0x1cb   : > { %v1481_v7 = vmul.f32 0.5, %v1480_v33 }
 0x1cd   : > { %v1482_v0 = vsub.f32 1.5, %v1481_v7  ;;  %v2037_v7 = vld [vmem:[%s2842_s2] ss:$0 sm:$0xff] }
 0x1ce   : > { %v2049_v54 = vpop.eup %2048 }
 0x1cf   : > { %v1483_v10 = vmul.f32 %v2047_v28, %v1482_v0  ;;  %v1489_v13 = vmul.f32 %v2049_v54, %v1477_v16  ;;  %vm1495_vm12 = vweird.f32 %v2049_v54 }
 0x1d0   : > { %vm1496_vm14 = vmor %vm1494_vm13, %vm1495_vm12 }
 0x1d1   : > { %v1490_v26 = vmul.f32 %v2049_v54, %v1489_v13  ;;  %v1487_v35 = vsel %vm1486_vm11, %v2047_v28, %v1483_v10 }
 0x1d2   : > { %v1683_v2 = vsel %vm1498_vm8, %v1487_v35, 0 }
 0x1d3   : > { %v1491_v59 = vmul.f32 0.5, %v1490_v26  ;;  %v1705_v40 = vand.u32 4294901760, %v1683_v2 }
 0x1d5   : > { %v1492_v22 = vsub.f32 1.5, %v1491_v59  ;;  %1744 = vmatmul.f32.vlgmr.msrb.gmra.mxu3 %v1705_v40  ;;  %v1706_v1 = vsub.f32 %v1683_v2, %v1705_v40  ;;  %v1887_v59 = vpop.permute.xlu2 %1886 }
 0x1d7   : > { %v1493_v39 = vmul.f32 %v2049_v54, %v1492_v22  ;;  %1772 = vmatmul.f32.vlgmr.msra.gmra.mxu0 %v1706_v1  ;;  %v1707_v21 = vand.u32 4294901760, %v1706_v1  ;;  %v2051_v22 = vld [vmem:[%s2218_s21 + $0x8] sm:$0xff]  ;;  %s2066_s21 = sshra.s32 %s1914_s17, 4  ;;  %s2067_s21 = int_to_ptr.hbm [resolvable:$true] %s2066_s21 }
 0x1d8   : > { %s2068_s18 = scalar_lea.hbm %s2067_s21, 16  ;;  %p2073_p0 = scmp.lt.s32.totalorder %s2067_s21, %s2848_s8 }
 0x1d9   : > { %1801 = vmatmul.f32.vlgmr.msra.gmra.mxu1 %v1707_v21  ;;  %v1708_v29 = vsub.f32 %v1706_v1, %v1707_v21  ;;  %v1497_v31 = vsel %vm1496_vm14, %v2049_v54, %v1493_v39  ;;  %p2069_p11 = scmp.ne.s32.totalorder %s2067_s21, %s2068_s18  ;;  %p2074_p1 = scmp.lt.s32.totalorder %s2072_s23, %s2068_s18 }
 0x1da   : > { %v1686_v3 = vsel %vm1498_vm8, %v1497_v31, 0 }
 0x1db   : > { %v1709_v34 = vand.u32 4294901760, %v1708_v29  ;;  %v1713_v37 = vand.u32 4294901760, %v1686_v3  ;;  %p2070_p12 = pnand %p2069_p11, %p2203_p5  ;;  %p2075_p2 = por %p2074_p1, %p2073_p0 }
 0x1dd   : > { %1710 = vmatmul.f32.vlgmr.msrb.gmra.mxu2 %v1709_v34  ;;  %1748 = vmatmul.f32.gmra.mxu3 %v1713_v37  ;;  %v1714_v42 = vsub.f32 %v1686_v3, %v1713_v37  ;;  %v1893_v34 = vpop.permute.xlu2 %1892  ;;  %p2071_p13 = pneg %p2070_p12 }
 0x1df   : > { %1777 = vmatmul.f32.gmra.mxu0 %v1714_v42  ;;  %v1715_v47 = vand.u32 4294901760, %v1714_v42  ;;  %p2076_p3 = pnand %p2075_p2, %p2071_p13 }
 0x1e1   : > { %1807 = vmatmul.f32.gmra.mxu1 %v1715_v47  ;;  %v1716_v50 = vsub.f32 %v1714_v42, %v1715_v47 }
 0x1e3   : > { %v1717_v56 = vand.u32 4294901760, %v1716_v50 }
 0x1e5   : > { %1718 = vmatmul.f32.gmra.mxu2 %v1717_v56  ;;  %1857 = vmatmul.f32.vlgmr.msra.gmra.mxu3 %v1705_v40 }
 0x1ed   : > { %1831 = vmatmul.f32.vlgmr.msra.gmra.mxu2 %v1705_v40  ;;  %1861 = vmatmul.f32.gmra.mxu3 %v1713_v37 }
 0x1f5   : > { %1835 = vmatmul.f32.gmra.mxu2 %v1713_v37 }
 0x212   : > { %v1562_v63 = vpop.f32.mrf.mxu1 }
 0x21a   : > { %v1528_v57 = vpop.f32.mrf.mxu0  ;;  %v1590_v8 = vpop.f32.mrf.mxu2 }
 0x21b   : > { %v1566_v9 = vpop.f32.mrf.mxu1  ;;  %v1563_v23 = vadd.f32 %v1562_v63, %v1528_v57 }
 0x21c   : > { %v1619_v5 = vpop.f32.mrf.mxu3 }
 0x21d   : > { %v1591_v27 = vadd.f32 %v1590_v8, %v1563_v23 }
 0x21f   : > { %v1620_v51 = vadd.f32 %v1619_v5, %v1591_v27 }
 0x223   : > { %v1536_v52 = vpop.f32.mrf.mxu0  ;;  %v1595_v14 = vpop.f32.mrf.mxu2 }
 0x224   : > { %v1675_v15 = vpop.f32.mrf.mxu1  ;;  %v1567_v53 = vadd.f32 %v1566_v9, %v1536_v52 }
 0x225   : > { %v1625_v11 = vpop.f32.mrf.mxu3 }
 0x226   : > { %v1596_v6 = vadd.f32 %v1595_v14, %v1567_v53 }
 0x228   : > { %v1626_v20 = vadd.f32 %v1625_v11, %v1596_v6 }
 0x22b   : > { %v1649_v48 = vpop.f32.mrf.mxu0 }
 0x22c   : > { %v1679_v24 = vpop.f32.mrf.mxu1  ;;  %v1650_v61 = vadd.f32 %v1649_v48, %v1620_v51 }
 0x22e   : > { %v1676_v58 = vadd.f32 %v1675_v15, %v1650_v61 }
 0x230   : > { %v1865_v44 = vsub.f32 %v2050_v43, %v1676_v58 }
 0x233   : > { %v1653_v18 = vpop.f32.mrf.mxu0 }
 0x234   : > { %v1654_v60 = vadd.f32 %v1653_v18, %v1626_v20 }
 0x236   : > { %v1680_v54 = vadd.f32 %v1679_v24, %v1654_v60 }
 0x238   : > { %v1866_v1 = vsub.f32 %v2051_v22, %v1680_v54 }
 0x254   : > { %v1773_v41 = vpop.f32.mrf.mxu0 }
 0x256   : > { %v1802_v4 = vpop.f32.mrf.mxu1 }
 0x258   : > { %v1745_v49 = vpop.f32.mrf.mxu3 }
 0x25c   : > { %v1778_v32 = vpop.f32.mrf.mxu0 }
 0x25e   : > { %v1808_v0 = vpop.f32.mrf.mxu1 }
 0x260   : > { %v1711_v55 = vpop.f32.mrf.mxu2  ;;  %v1749_v30 = vpop.f32.mrf.mxu3 }
 0x261   : > { %v1746_v38 = vadd.f32 %v1745_v49, %v1711_v55 }
 0x263   : > { %v1774_v62 = vadd.f32 %v1773_v41, %v1746_v38 }
 0x265   : > { %v1803_v12 = vadd.f32 %v1802_v4, %v1774_v62 }
 0x268   : > { %v1719_v46 = vpop.f32.mrf.mxu2  ;;  %v1858_v36 = vpop.f32.mrf.mxu3 }
 0x269   : > { %v1750_v45 = vadd.f32 %v1749_v30, %v1719_v46 }
 0x26b   : > { %v1779_v28 = vadd.f32 %v1778_v32, %v1750_v45 }
 0x26d   : > { %v1809_v13 = vadd.f32 %v1808_v0, %v1779_v28 }
 0x270   : > { %v1832_v19 = vpop.f32.mrf.mxu2  ;;  %v1862_v40 = vpop.f32.mrf.mxu3 }
 0x271   : > { %v1833_v25 = vadd.f32 %v1832_v19, %v1803_v12 }
 0x273   : > { %v1859_v16 = vadd.f32 %v1858_v36, %v1833_v25 }
 0x275   : > { %v1867_v33 = vmul.f32 %v1865_v44, %v1859_v16 }
 0x277   : > { %v1873_v10 = vmul.f32 %v2036_v17, %v1867_v33 }
 0x278   : > { %v1836_v26 = vpop.f32.mrf.mxu2 }
 0x279   : > { %v1879_v35 = vadd.f32 %v2037_v7, %v1873_v10  ;;  %v1837_v2 = vadd.f32 %v1836_v26, %v1809_v13 }
 0x27b   : > { %v1894_v39 = vadd.f32 %v1887_v59, %v1879_v35  ;;  %v1863_v21 = vadd.f32 %v1862_v40, %v1837_v2 }
 0x27d   : > { %v1868_v29 = vmul.f32 %v1866_v1, %v1863_v21  ;;  %1896 = vst [vmem:[%s298_s12] sm:$0xff] %v1894_v39 }
 0x27f   : > { %v1874_v31 = vmul.f32 %v2036_v17, %v1868_v29 }
 0x281   : > { %v1880_v3 = vadd.f32 %v2037_v7, %v1874_v31 }
 0x283   : > { %v1895_v37 = vadd.f32 %v1893_v34, %v1880_v3 }
 0x285   : > { %1897 = vst [vmem:[%s298_s12 + $0x8] sm:$0xff] %v1895_v37 }
 0x286   : > { %2079 = shalt.err (!%p2076_p3)
}
 0x287   : > { %s2118_s19 = smov 128   ;;  %s2119_s26 = smov 8  }
 0x288   : > { %1990 = dma.vmem_to_hbm [thread:$0]  (%p2203_p5), %s1912_s13, 256, %s1914_s17, %s1899_s9, %s2118_s19, %s2118_s19, %s2119_s26  }
 0x289 PF: > { %p1996_p4 = scmp.ge.s32.totalorder %s2114_s30, 2  ;;  %s1928_s10 = sand.u32 1, %s2102_s27  }
 0x28a   : > { %s1929_s12 = scalar_lea.sflag [#allocation3], %s1928_s10 }
 0x28b   : > { %p1993_p7 = pnand %p1996_p4, %p2207_p6 }
 0x28d   : > { %p1994_p8 = pneg %p1993_p7 }
 0x28f   : > { %2097 = dma.done.wait (%p1994_p8), %s1929_s12, 256  }
 0x290   : > { %2099 = vsyncadd (%p1994_p8), %s1929_s12, 4294967040  ;;  %p18_p9 = scmp.ge.s32.totalorder %s2190_s11, 4   ;;  %s2874_s27 = smov %s2106_s28 }
 0x291   : > { %s2875_s28 = smov %s2110_s29  ;;  %s2876_s29 = smov %s2201_s14 }
 0x292   : > { %s2877_s30 = smov %s2190_s11  ;;  %20 = sbr.rel (!%p18_p9) target bundleno = 3 (0x3), region = 87 }
 0x297   :  { %1935 = vsyncpa [#allocation3], 1 }
 0x298   :  { %1937 = vsyncpa [#allocation3 + $0x1], 1 }

</bundles_post_ra>
